<compile_context>
chip_gen: v7x
topology: tpu7x:2x2x1
jax: 0.10.0
libtpu: 0.0.40
codegen_flags: <defaults>
</compile_context>

<pallas_src>
import functools
import math

import jax
import jax.numpy as jnp
from jax.experimental import pallas as pl
from jax.experimental.pallas import tpu as pltpu

SMOOTH = 1.0   # BinaryDiceLoss default
LANES = 128


def _dice_kernel(p_ref, t_ref, o_ref, num_acc, den_acc, *, hw, smooth):
    # p_ref, t_ref: (1, C, TR, 128) VMEM tiles.  o_ref: (1, 1, C) per-batch output.
    # num_acc/den_acc: (C, TR, 128) f32 scratch, persistent across the spatial axis.
    j = pl.program_id(1)
    nj = pl.num_programs(1)
    C, TR, L = p_ref.shape[1], p_ref.shape[2], p_ref.shape[3]

    @pl.when(j == 0)
    def _init():
        num_acc[...] = jnp.zeros_like(num_acc)
        den_acc[...] = jnp.zeros_like(den_acc)

    p = p_ref[0].astype(jnp.float32)          # (C, TR, L)
    t = t_ref[0].astype(jnp.float32)          # (C, TR, L)

    # softmax over the class axis (axis 0) == F.softmax(predict, dim=1).
    # C is a leading axis -> max/sum over it are elementwise across C slabs (VPU).
    m = jnp.max(p, axis=0, keepdims=True)     # (1, TR, L)
    e = jnp.exp(p - m)                        # EUP
    s = jnp.sum(e, axis=0, keepdims=True)     # (1, TR, L), s >= 1
    inv = pl.reciprocal(s, approx=True)       # EUP slot
    inv = inv * (2.0 - s * inv)               # one Newton step -> full f32 accuracy
    sm = e * inv                              # (C, TR, L)

    # Mask padded spatial positions: softmax of padded logits is non-zero and would
    # otherwise pollute the sum(pred^2) term.  (target padding is exact zero.)
    row_ids = jax.lax.broadcasted_iota(jnp.int32, (TR, L), 0)
    lane_ids = jax.lax.broadcasted_iota(jnp.int32, (TR, L), 1)
    flat = (j * TR + row_ids) * L + lane_ids
    sm = jnp.where((flat < hw)[None, :, :], sm, 0.0)

    # Steady state: VPU-only partial sums (lane/sublane reductions deferred).
    num_acc[...] += sm * t
    den_acc[...] += sm * sm + t * t

    @pl.when(j == nj - 1)
    def _finalize():
        num = jnp.sum(jnp.sum(num_acc[...], axis=-1), axis=-1) + smooth   # (C,)
        den = jnp.sum(jnp.sum(den_acc[...], axis=-1), axis=-1) + smooth   # (C,)
        o_ref[...] = (1.0 - num / den).reshape(1, 1, C)


def dice_loss(predict, target, smooth=SMOOTH):
    """predict, target: (N, C, *spatial), same shape.  Returns scalar f32 loss."""
    assert predict.shape == target.shape, "predict & target shape do not match"
    # TODO(synk): DiceLoss weight / ignore_index args not implemented (defaults None).
    N, C = predict.shape[0], predict.shape[1]
    hw = int(math.prod(predict.shape[2:]))

    rows = -(-hw // LANES)                    # ceil(hw / 128)
    # ~2 MiB f32 per input block: large enough for ~85% of HBM roofline, small
    # enough that 2 inputs x 2 pipeline buffers + 2 accumulators fit the scoped
    # VMEM budget on v5e / v6e / v7x.
    bytes_per_row = C * LANES * 4
    tile_rows = max(8, ((2 * 1024 * 1024) // bytes_per_row) // 8 * 8)
    tile_rows = min(tile_rows, -(-rows // 8) * 8)
    rows_pad = -(-rows // tile_rows) * tile_rows
    hw_pad = rows_pad * LANES
    num_tiles = rows_pad // tile_rows

    p3 = predict.reshape(N, C, hw)
    t3 = target.reshape(N, C, hw)
    if hw_pad != hw:
        pad = ((0, 0), (0, 0), (0, hw_pad - hw))
        p3 = jnp.pad(p3, pad)
        t3 = jnp.pad(t3, pad)
    p4 = p3.reshape(N, C, rows_pad, LANES)
    t4 = t3.reshape(N, C, rows_pad, LANES)

    loss_nc = pl.pallas_call(
        functools.partial(_dice_kernel, hw=hw, smooth=float(smooth)),
        out_shape=jax.ShapeDtypeStruct((N, 1, C), jnp.float32),
        grid=(N, num_tiles),
        in_specs=[
            pl.BlockSpec((1, C, tile_rows, LANES), lambda n, j: (n, 0, j, 0)),
            pl.BlockSpec((1, C, tile_rows, LANES), lambda n, j: (n, 0, j, 0)),
        ],
        out_specs=pl.BlockSpec((1, 1, C), lambda n, j: (n, 0, 0)),
        scratch_shapes=[
            pltpu.VMEM((C, tile_rows, LANES), jnp.float32),
            pltpu.VMEM((C, tile_rows, LANES), jnp.float32),
        ],
        compiler_params=pltpu.CompilerParams(
            dimension_semantics=("parallel", "arbitrary"),
            vmem_limit_bytes=32 * 1024 * 1024,
        ),
    )(p4, t4)

    # sum_c mean_n(loss_nc) / C  ==  mean over (N, C)
    return jnp.mean(loss_nc[:, 0, :])


def _reference_dice_loss(predict, target, smooth=SMOOTH, p_exp=2):
    """Pure-JAX reference mirroring the PyTorch module (for sanity check)."""
    N, C = predict.shape[0], predict.shape[1]
    p = jax.nn.softmax(predict.astype(jnp.float32), axis=1).reshape(N, C, -1)
    t = target.astype(jnp.float32).reshape(N, C, -1)
    total = 0.0
    for i in range(C):
        num = jnp.sum(p[:, i] * t[:, i], axis=1) + smooth
        den = jnp.sum(p[:, i] ** p_exp + t[:, i] ** p_exp, axis=1) + smooth
        total = total + jnp.mean(1.0 - num / den)
    return total / C


if __name__ == "__main__":
    key = jax.random.PRNGKey(0)
    k1, k2 = jax.random.split(key)

    N, C, H, W = 2, 4, 16, 16
    predict = jax.random.normal(k1, (N, C, H, W), dtype=jnp.float32)
    # one-hot-like target (module docs say one-hot encoded input)
    labels = jax.random.randint(k2, (N, H, W), 0, C)
    target = jax.nn.one_hot(labels, C, axis=1, dtype=jnp.float32)  # (N, C, H, W)

    out = jax.block_until_ready(dice_loss(predict, target))
    ref = jax.block_until_ready(_reference_dice_loss(predict, target))
    assert jnp.allclose(out, ref, rtol=1e-4, atol=1e-5), (out, ref)

    print("KERNEL_OK")
</pallas_src>

<mosaic_0001>
module attributes {stable_mosaic.version = 11 : i64} {
  func.func @_dice_kernel(%arg0: i32, %arg1: i32, %arg2: memref<1x4x8x128xf32, #tpu.memory_space<vmem>>, %arg3: memref<1x4x8x128xf32, #tpu.memory_space<vmem>>, %arg4: memref<1x1x4xf32, #tpu.memory_space<vmem>>, %arg5: memref<4x8x128xf32, #tpu.memory_space<vmem>>, %arg6: memref<4x8x128xf32, #tpu.memory_space<vmem>>) attributes {dimension_semantics = [#tpu.dimension_semantics<parallel>, #tpu.dimension_semantics<arbitrary>], iteration_bounds = array<i64: 2, 1>, scalar_prefetch = 0 : i64, scratch_operands = 2 : i64, tpu.core_type = #tpu.core_type<tc>, window_params = [{transform_indices = @transform_0, window_bounds = array<i64: 1, 4, 8, 128>}, {transform_indices = @transform_1, window_bounds = array<i64: 1, 4, 8, 128>}, {transform_indices = @transform_2, window_bounds = array<i64: 1, 1, 4>}]} {
    %c0_i32 = arith.constant 0 : i32
    %0 = arith.cmpi eq, %arg1, %c0_i32 : i32
    %1 = arith.extui %0 : i1 to i32
    %c0_i32_0 = arith.constant 0 : i32
    %2 = arith.cmpi ne, %1, %c0_i32_0 : i32
    scf.if %2 {
      %cst_25 = arith.constant 0.000000e+00 : f32
      %49 = vector.broadcast %cst_25 : f32 to vector<4x8x128xf32>
      %c0_26 = arith.constant 0 : index
      %c0_27 = arith.constant 0 : index
      %c0_28 = arith.constant 0 : index
      %50 = vector.load %arg5[%c0_26, %c0_27, %c0_28] : memref<4x8x128xf32, #tpu.memory_space<vmem>>, vector<4x8x128xf32>
      tpu.vector_store %arg5[%c0_26, %c0_27, %c0_28], %49 {strides = array<i32>} : memref<4x8x128xf32, #tpu.memory_space<vmem>>, vector<4x8x128xf32>,
      %cst_29 = arith.constant 0.000000e+00 : f32
      %51 = vector.broadcast %cst_29 : f32 to vector<4x8x128xf32>
      %c0_30 = arith.constant 0 : index
      %c0_31 = arith.constant 0 : index
      %c0_32 = arith.constant 0 : index
      %52 = vector.load %arg6[%c0_30, %c0_31, %c0_32] : memref<4x8x128xf32, #tpu.memory_space<vmem>>, vector<4x8x128xf32>
      tpu.vector_store %arg6[%c0_30, %c0_31, %c0_32], %51 {strides = array<i32>} : memref<4x8x128xf32, #tpu.memory_space<vmem>>, vector<4x8x128xf32>,
    } else {
    }
    %c0 = arith.constant 0 : index
    %c0_1 = arith.constant 0 : index
    %c0_2 = arith.constant 0 : index
    %c0_3 = arith.constant 0 : index
    %3 = vector.load %arg2[%c0, %c0_1, %c0_2, %c0_3] : memref<1x4x8x128xf32, #tpu.memory_space<vmem>>, vector<1x4x8x128xf32>
    %4 = vector.shape_cast %3 : vector<1x4x8x128xf32> to vector<4x8x128xf32>
    %c0_4 = arith.constant 0 : index
    %c0_5 = arith.constant 0 : index
    %c0_6 = arith.constant 0 : index
    %c0_7 = arith.constant 0 : index
    %5 = vector.load %arg3[%c0_4, %c0_5, %c0_6, %c0_7] : memref<1x4x8x128xf32, #tpu.memory_space<vmem>>, vector<1x4x8x128xf32>
    %6 = vector.shape_cast %5 : vector<1x4x8x128xf32> to vector<4x8x128xf32>
    %cst = arith.constant dense<0xFF800000> : vector<8x128xf32>
    %7 = vector.multi_reduction <maximumf>, %4, %cst [0] : vector<4x8x128xf32> to vector<8x128xf32>
    %8 = vector.shape_cast %7 : vector<8x128xf32> to vector<1x8x128xf32>
    %9 = vector.broadcast %8 : vector<1x8x128xf32> to vector<4x8x128xf32>
    %10 = arith.subf %4, %9 : vector<4x8x128xf32>
    %11 = math.exp %10 : vector<4x8x128xf32>
    %cst_8 = arith.constant dense<0.000000e+00> : vector<8x128xf32>
    %12 = vector.multi_reduction <add>, %11, %cst_8 [0] : vector<4x8x128xf32> to vector<8x128xf32>
    %13 = vector.shape_cast %12 : vector<8x128xf32> to vector<1x8x128xf32>
    %14 = tpu.reciprocal %13 {approx = true} : vector<1x8x128xf32> -> vector<1x8x128xf32>
    %15 = arith.mulf %13, %14 : vector<1x8x128xf32>
    %cst_9 = arith.constant 2.000000e+00 : f32
    %16 = vector.broadcast %cst_9 : f32 to vector<1x8x128xf32>
    %17 = arith.subf %16, %15 : vector<1x8x128xf32>
    %18 = arith.mulf %14, %17 : vector<1x8x128xf32>
    %19 = vector.broadcast %18 : vector<1x8x128xf32> to vector<4x8x128xf32>
    %20 = arith.mulf %11, %19 : vector<4x8x128xf32>
    %21 = tpu.iota {dimensions = array<i32: 0>} : vector<8x128xi32>
    %22 = tpu.iota {dimensions = array<i32: 1>} : vector<8x128xi32>
    %c8_i32 = arith.constant 8 : i32
    %23 = arith.muli %arg1, %c8_i32 : i32
    %24 = vector.broadcast %23 : i32 to vector<8x128xi32>
    %25 = arith.addi %24, %21 : vector<8x128xi32>
    %c128_i32 = arith.constant 128 : i32
    %26 = vector.broadcast %c128_i32 : i32 to vector<8x128xi32>
    %27 = arith.muli %25, %26 : vector<8x128xi32>
    %28 = arith.addi %27, %22 : vector<8x128xi32>
    %c256_i32 = arith.constant 256 : i32
    %29 = vector.broadcast %c256_i32 : i32 to vector<8x128xi32>
    %30 = arith.cmpi slt, %28, %29 : vector<8x128xi32>
    %31 = vector.shape_cast %30 : vector<8x128xi1> to vector<1x8x128xi1>
    %cst_10 = arith.constant 0.000000e+00 : f32
    %32 = vector.shape_cast %31 : vector<1x8x128xi1> to vector<1x8x128xi1>
    %33 = vector.broadcast %32 : vector<1x8x128xi1> to vector<4x8x128xi1>
    %34 = vector.broadcast %cst_10 : f32 to vector<4x8x128xf32>
    %35 = arith.select %33, %20, %34 : vector<4x8x128xi1>, vector<4x8x128xf32>
    %c0_11 = arith.constant 0 : index
    %c0_12 = arith.constant 0 : index
    %c0_13 = arith.constant 0 : index
    %36 = vector.load %arg5[%c0_11, %c0_12, %c0_13] : memref<4x8x128xf32, #tpu.memory_space<vmem>>, vector<4x8x128xf32>
    %37 = arith.mulf %35, %6 : vector<4x8x128xf32>
    %38 = arith.addf %36, %37 : vector<4x8x128xf32>
    %c0_14 = arith.constant 0 : index
    %c0_15 = arith.constant 0 : index
    %c0_16 = arith.constant 0 : index
    %39 = vector.load %arg5[%c0_14, %c0_15, %c0_16] : memref<4x8x128xf32, #tpu.memory_space<vmem>>, vector<4x8x128xf32>
    tpu.vector_store %arg5[%c0_14, %c0_15, %c0_16], %38 {strides = array<i32>} : memref<4x8x128xf32, #tpu.memory_space<vmem>>, vector<4x8x128xf32>,
    %c0_17 = arith.constant 0 : index
    %c0_18 = arith.constant 0 : index
    %c0_19 = arith.constant 0 : index
    %40 = vector.load %arg6[%c0_17, %c0_18, %c0_19] : memref<4x8x128xf32, #tpu.memory_space<vmem>>, vector<4x8x128xf32>
    %41 = arith.mulf %35, %35 : vector<4x8x128xf32>
    %42 = arith.mulf %6, %6 : vector<4x8x128xf32>
    %43 = arith.addf %41, %42 : vector<4x8x128xf32>
    %44 = arith.addf %40, %43 : vector<4x8x128xf32>
    %c0_20 = arith.constant 0 : index
    %c0_21 = arith.constant 0 : index
    %c0_22 = arith.constant 0 : index
    %45 = vector.load %arg6[%c0_20, %c0_21, %c0_22] : memref<4x8x128xf32, #tpu.memory_space<vmem>>, vector<4x8x128xf32>
    tpu.vector_store %arg6[%c0_20, %c0_21, %c0_22], %44 {strides = array<i32>} : memref<4x8x128xf32, #tpu.memory_space<vmem>>, vector<4x8x128xf32>,
    %c0_i32_23 = arith.constant 0 : i32
    %46 = arith.cmpi eq, %arg1, %c0_i32_23 : i32
    %47 = arith.extui %46 : i1 to i32
    %c0_i32_24 = arith.constant 0 : i32
    %48 = arith.cmpi ne, %47, %c0_i32_24 : i32
    scf.if %48 {
      %c0_25 = arith.constant 0 : index
      %c0_26 = arith.constant 0 : index
      %c0_27 = arith.constant 0 : index
      %49 = vector.load %arg5[%c0_25, %c0_26, %c0_27] : memref<4x8x128xf32, #tpu.memory_space<vmem>>, vector<4x8x128xf32>
      %cst_28 = arith.constant dense<0.000000e+00> : vector<4x8xf32>
      %50 = vector.multi_reduction <add>, %49, %cst_28 [2] : vector<4x8x128xf32> to vector<4x8xf32>
      %cst_29 = arith.constant dense<0.000000e+00> : vector<4xf32>
      %51 = vector.multi_reduction <add>, %50, %cst_29 [1] : vector<4x8xf32> to vector<4xf32>
      %cst_30 = arith.constant 1.000000e+00 : f32
      %52 = vector.broadcast %cst_30 : f32 to vector<4xf32>
      %53 = arith.addf %51, %52 : vector<4xf32>
      %c0_31 = arith.constant 0 : index
      %c0_32 = arith.constant 0 : index
      %c0_33 = arith.constant 0 : index
      %54 = vector.load %arg6[%c0_31, %c0_32, %c0_33] : memref<4x8x128xf32, #tpu.memory_space<vmem>>, vector<4x8x128xf32>
      %cst_34 = arith.constant dense<0.000000e+00> : vector<4x8xf32>
      %55 = vector.multi_reduction <add>, %54, %cst_34 [2] : vector<4x8x128xf32> to vector<4x8xf32>
      %cst_35 = arith.constant dense<0.000000e+00> : vector<4xf32>
      %56 = vector.multi_reduction <add>, %55, %cst_35 [1] : vector<4x8xf32> to vector<4xf32>
      %cst_36 = arith.constant 1.000000e+00 : f32
      %57 = vector.broadcast %cst_36 : f32 to vector<4xf32>
      %58 = arith.addf %56, %57 : vector<4xf32>
      %59 = arith.divf %53, %58 : vector<4xf32>
      %cst_37 = arith.constant 1.000000e+00 : f32
      %60 = vector.broadcast %cst_37 : f32 to vector<4xf32>
      %61 = arith.subf %60, %59 : vector<4xf32>
      %62 = vector.shape_cast %61 : vector<4xf32> to vector<1x1x4xf32>
      %c0_38 = arith.constant 0 : index
      %c0_39 = arith.constant 0 : index
      %c0_40 = arith.constant 0 : index
      %63 = vector.load %arg4[%c0_38, %c0_39, %c0_40] : memref<1x1x4xf32, #tpu.memory_space<vmem>>, vector<1x1x4xf32>
      tpu.vector_store %arg4[%c0_38, %c0_39, %c0_40], %62 {strides = array<i32>} : memref<1x1x4xf32, #tpu.memory_space<vmem>>, vector<1x1x4xf32>,
    } else {
    }
    return
  }
  func.func @transform_0(%arg0: i32, %arg1: i32) -> (i32, i32, i32, i32) {
    %c0_i32 = arith.constant 0 : i32
    %c0_i32_0 = arith.constant 0 : i32
    %c0_i32_1 = arith.constant 0 : i32
    return %arg0, %c0_i32, %arg1, %c0_i32_0 : i32, i32, i32, i32
  }
  func.func @transform_1(%arg0: i32, %arg1: i32) -> (i32, i32, i32, i32) {
    %c0_i32 = arith.constant 0 : i32
    %c0_i32_0 = arith.constant 0 : i32
    %c0_i32_1 = arith.constant 0 : i32
    return %arg0, %c0_i32, %arg1, %c0_i32_0 : i32, i32, i32, i32
  }
  func.func @transform_2(%arg0: i32, %arg1: i32) -> (i32, i32, i32) {
    %c0_i32 = arith.constant 0 : i32
    %c0_i32_0 = arith.constant 0 : i32
    %c0_i32_1 = arith.constant 0 : i32
    return %arg0, %c0_i32, %c0_i32_0 : i32, i32, i32
  }
}

</mosaic_0001>

<bundles_post_ra>
// kernel: tpu_custom_call.1
= control target key start
LH: loop header
LB: loop body
LE: loop exit
PB: predicated region body
PF: predicated region fallthrough
CT: control target
= control target key end

     0   :  { %7 = vsyncpa [#allocation5], 0  ;;  %s1060_s0 = inlined_call_operand.hbm [shape: f32[2,4,8,128], index: 0, kind: input, shape index: {}]   ;;  %s1061_s1 = inlined_call_operand.hbm [shape: f32[2,4,8,128], index: 1, kind: input, shape index: {}]   ;;  %s1062_s2 = inlined_call_operand.hbm [shape: f32[2,1,4], index: 2, kind: output, shape index: {}]  }
   0x1   :  { %9 = vsyncpa [#allocation5 + $0x1], 0 }
   0x2   :  { %10 = vsyncpa [#allocation8], 0 }
   0x3   :  { %12 = vsyncpa [#allocation8 + $0x1], 0 }
   0x4   :  { %13 = vsyncpa [#allocation6], 0 }
   0x5   :  { %15 = vsyncpa [#allocation6 + $0x1], 0  ;;  %s800_s9 = smov 0   ;;  %s802_s10 = smov 0  }
   0x6   :  { %s804_s11 = smov 0   ;;  %s806_s12 = smov 0  }
   0x7   :  { %s808_s13 = smov 0   ;;  %s810_s14 = smov 0  }
   0x8 LB: > { %s533_s15 = sadd.s32 4294967295, %s778_s14   ;;  %s534_s16 = sadd.s32 4294967294, %s778_s14   ;;  %s778_s14 = sphi %s810_s14, %s21_s14   ;;  %s774_s13 = sphi %s808_s13, %s1080_s13   ;;  %s770_s12 = sphi %s806_s12, %s1079_s12   ;;  %s766_s11 = sphi %s804_s11, %s1078_s11   ;;  %s762_s10 = sphi %s802_s10, %s1077_s10   ;;  %s758_s9 = sphi %s800_s9, %s1076_s9  }
   0x9   : > { %s33_s17 = sadd.s32 1, %s774_s13  ;;  %s42_s18 = sadd.s32 1, %s766_s11 }
   0xa   : > { %p35_p0 = scmp.ge.s32.totalorder %s33_s17, 2  ;;  %p49_p1 = scmp.ne.s32.totalorder %s766_s11, %s762_s10 }
   0xb   : > { %p50_p2 = scmp.eq.s32.totalorder %s778_s14, 0  ;;  %p55_p3 = scmp.ne.s32.totalorder %s762_s10, %s758_s9 }
   0xc   : > { %s1082_s17 = smov (%p35_p0, %s33_s17), 0  ;;  %p56_p5 = scmp.eq.s32.totalorder %s533_s15, 0 }
   0xd   : > { %p841_p4 = por %p50_p2, %p49_p1  ;;  %s37_s20 = ssub.s32 %s774_s13, %s1082_s17 }
   0xe   : > { %p107_p6 = scmp.eq.s32.totalorder %s533_s15, 1  ;;  %p40_p7 = scmp.eq.s32.totalorder %s37_s20, 0 }
   0xf   : > { %p847_p8 = por %p56_p5, %p55_p3  ;;  %p113_p10 = scmp.eq.s32.totalorder %s534_s16, 1 }
  0x10   : > { %p851_p9 = por %p107_p6, %p49_p1  ;;  %p568_p13 = scmp.lt.s32.totalorder %s778_s14, 2 }
  0x11   : > { %s1066_s21 = scalar_select %p847_p8, 1, 0 }
  0x12   : > { %s1067_s22 = scalar_select %p851_p9, 1, 0 }
  0x13   : > { %s856_s23 = scalar_select %p40_p7, %s766_s11, %s42_s18  }
  0x14   : > { %p858_p11 = por %p113_p10, %p55_p3  ;;  %s865_s25 = sand.u32 1, %s766_s11  }
  0x15   : > { %s537_s26 = sshll.u32 %s865_s25, 5  ;;  %s549_s27 = sshll.u32 %s774_s13, 9 }
  0x16   : > { %s1068_s24 = scalar_select %p858_p11, 1, 0 }
  0x17   : > { %s874_s30 = scalar_lea.hbm %s1060_s0, %s549_s27  ;;  %s137_s3 = scalar_lea.vmem [#allocation4], %s537_s26 }
  0x18   : > { %s145_s4 = sshll.u32 %s137_s3, 4  ;;  %p882_p0 = pnand %p568_p13, %p841_p4  ;;  %s878_s4 = int_to_ptr.vmem [resolvable:$true] %s145_s4 }
  0x19   : > { %s134_s6 = scalar_lea.sflag [#allocation5], %s865_s25  ;;  %s632_s7 = scalar_lea.hbm %s874_s30, 512 }
  0x1a   : > { %p633_p2 = scmp.ne.s32.totalorder %s874_s30, %s632_s7  ;;  %p634_p3 = pneg %p882_p0 }
  0x1b   : > { %s637_s16 = scalar_lea.hbm %s1060_s0, 1024  ;;  %p638_p4 = scmp.lt.u32.totalorder %s874_s30, %s1060_s0 }
  0x1c   : > { %p635_p5 = pnand %p634_p3, %p633_p2  ;;  %p639_p7 = scmp.lt.u32.totalorder %s637_s16, %s632_s7 }
  0x1d   : > { %p641_p13 = scmp.lt.u32.totalorder %s632_s7, %s874_s30 }
  0x1e   : > { %p636_p6 = pneg %p635_p5  ;;  %p640_p10 = por %p639_p7, %p638_p4 }
  0x20   : > { %p642_p12 = por %p641_p13, %p640_p10 }
  0x22   : > { %p643_p1 = pnand %p642_p12, %p636_p6 }
  0x24   : > { %646 = shalt.err (!%p643_p1)
}
  0x25   : > { %s647_s20 = scalar_lea.vmem %s878_s4, 512  ;;  %s780_s28 = smov [#allocation4]  }
  0x26   : > { %p648_p2 = scmp.ne.s32.totalorder %s878_s4, %s647_s20  ;;  %s652_s29 = sshll.u32 %s780_s28, 4  ;;  %s653_s29 = int_to_ptr.vmem [resolvable:$false] %s652_s29 }
  0x27   : > { %s654_s3 = scalar_lea.vmem %s653_s29, 1024  ;;  %p655_p9 = scmp.lt.s32.totalorder %s878_s4, %s653_s29 }
  0x28   : > { %p650_p5 = pnand %p648_p2, %p634_p3  ;;  %p656_p4 = scmp.lt.s32.totalorder %s654_s3, %s647_s20 }
  0x2a   : > { %p651_p11 = pneg %p650_p5  ;;  %p657_p7 = por %p656_p4, %p655_p9 }
  0x2c   : > { %p658_p10 = pnand %p657_p7, %p651_p11 }
  0x2e   : > { %661 = shalt.err (!%p658_p10)
}
  0x2f   : > { %s781_s7 = smov 128   ;;  %s782_s8 = smov 8  }
  0x30   : > { %560 = dma.hbm_to_vmem [thread:$0]  (!%p882_p0), %s874_s30, 512, %s878_s4, %s134_s6, %s781_s7, %s781_s7, %s782_s8  }
  0x31   : > { %p175_p9 = scmp.lt.s32.totalorder %s778_s14, 3  ;;  %s924_s18 = scalar_lea.hbm %s1061_s1, %s549_s27 }
  0x32   : > { %p1070_p11 = scmp.ge.s32.totalorder %s778_s14, 1  ;;  %s159_s20 = scalar_lea.vmem [#allocation7], %s537_s26 }
  0x33   : > { %s167_s28 = sshll.u32 %s159_s20, 4  ;;  %s156_s30 = scalar_lea.sflag [#allocation8], %s865_s25  ;;  %s934_s28 = int_to_ptr.vmem [resolvable:$true] %s167_s28 }
  0x34   : > { %p928_p12 = pnand %p1070_p11, %p175_p9  ;;  %s662_s4 = scalar_lea.hbm %s924_s18, 512 }
  0x35   : > { %p663_p1 = scmp.ne.s32.totalorder %s924_s18, %s662_s4  ;;  %s667_s29 = scalar_lea.hbm %s1061_s1, 1024 }
  0x36   : > { %p668_p2 = scmp.lt.u32.totalorder %s924_s18, %s1061_s1  ;;  %p669_p5 = scmp.lt.u32.totalorder %s667_s29, %s662_s4 }
  0x37   : > { %p665_p6 = pnand %p663_p1, %p634_p3  ;;  %p671_p7 = scmp.lt.u32.totalorder %s662_s4, %s924_s18 }
  0x38   : > { %p670_p4 = por %p669_p5, %p668_p2 }
  0x39   : > { %p666_p13 = pneg %p665_p6 }
  0x3a   : > { %p672_p10 = por %p671_p7, %p670_p4 }
  0x3c   : > { %p673_p9 = pnand %p672_p10, %p666_p13 }
  0x3e   : > { %676 = shalt.err (!%p673_p9)
}
  0x3f   : > { %s677_s26 = scalar_lea.vmem %s934_s28, 512  ;;  %s783_s16 = smov [#allocation7]  }
  0x40   : > { %p678_p11 = scmp.ne.s32.totalorder %s934_s28, %s677_s26  ;;  %s682_s20 = sshll.u32 %s783_s16, 4  ;;  %s683_s20 = int_to_ptr.vmem [resolvable:$false] %s682_s20 }
  0x41   : > { %s684_s27 = scalar_lea.vmem %s683_s20, 1024  ;;  %p685_p8 = scmp.lt.s32.totalorder %s934_s28, %s683_s20 }
  0x42   : > { %p680_p1 = pnand %p678_p11, %p634_p3  ;;  %p686_p2 = scmp.lt.s32.totalorder %s684_s27, %s677_s26 }
  0x44   : > { %p681_p6 = pneg %p680_p1  ;;  %p687_p5 = por %p686_p2, %p685_p8 }
  0x46   : > { %p688_p4 = pnand %p687_p5, %p681_p6 }
  0x48   : > { %691 = shalt.err (!%p688_p4)
}
  0x49   : > { %563 = dma.hbm_to_vmem [thread:$0]  (!%p882_p0), %s924_s18, 512, %s934_s28, %s156_s30, %s781_s7, %s781_s7, %s782_s8  }
  0x4a   : > { %179 = sbr.rel (%p928_p12) target bundleno = 463 (0x1cf), region = 28  ;;  %s968_s4 = sand.u32 (!%p928_p12), 1, %s762_s10  }
  0x4b   : > { %s544_s6 = sshll.u32 (!%p928_p12), %s968_s4, 5  ;;  %s182_s29 = scalar_lea.sflag (!%p928_p12), [#allocation5], %s968_s4 }
  0x4c   : > { %s185_s5 = scalar_lea.vmem (!%p928_p12), [#allocation4], %s544_s6  ;;  %p1072_p8 = scmp.ne.s32.totalorder (!%p928_p12), %s1066_s21, 0 }
  0x51   : > { %745 = dma.done.wait (%p1072_p8), %s182_s29, 512  }
  0x52   : > { %747 = vsyncadd (%p1072_p8), %s182_s29, 4294966784  ;;  %s191_s25 = scalar_lea.sflag [#allocation8], %s968_s4  ;;  %s977_s7 = scalar_lea.vmem [#allocation7], %s544_s6 }
  0x53   : > { %749 = dma.done.wait (%p1072_p8), %s191_s25, 512  }
  0x54   : > { %751 = vsyncadd (%p1072_p8), %s191_s25, 4294966784  ;;  %v265_v0 = vlaneseq  ;;  %v231_v4 = vld [vmem:[%s185_s5] sm:$0xff]  ;;  %v232_v5 = vld [vmem:[%s185_s5 + $0x8] sm:$0xff]  ;;  %vm356_vm1 = vcmask 1041409   ;;  %vm358_vm2 = vcmask 1042434   ;;  %vm360_vm3 = vcmask 1043459  }
  0x55   : > { %v233_v6 = vld [vmem:[%s185_s5 + $0x10] sm:$0xff]  ;;  %v234_v7 = vld [vmem:[%s185_s5 + $0x18] sm:$0xff]  ;;  %v239_v8 = vmax.f32 %v231_v4, %v232_v5  ;;  %v235_v31 = vld [vmem:[%s977_s7] sm:$0xff]  ;;  %vm363_vm4 = vcmask 60416   ;;  %s546_s21 = sshll.u32 %s770_s12, 4  ;;  %s218_s8 = scalar_lea.vmem [#allocation9], %s968_s4 }
  0x56   : > { %v266_v1 = vshrl.u32 %v265_v0, 7  ;;  %v268_v2 = vand.u32 127, %v265_v0  ;;  %v240_v9 = vmax.f32 %v233_v6, %v234_v7  ;;  %v237_v33 = vld [vmem:[%s977_s7 + $0x10] sm:$0xff]  ;;  %v236_v34 = vld [vmem:[%s977_s7 + $0x8] sm:$0xff]  ;;  %v238_v35 = vld [vmem:[%s977_s7 + $0x18] sm:$0xff]  ;;  %v305_v40 = vmul.f32 %v235_v31, %v235_v31  ;;  %s432_s18 = sshll.u32 %s218_s8, 4  ;;  %s1011_s30 = scalar_lea.hbm %s1062_s2, %s546_s21  ;;  %s1013_s18 = int_to_ptr.vmem [resolvable:$true] %s432_s18 }
  0x57   : > { %v307_v41 = vmul.f32 %v237_v33, %v237_v33  ;;  %v306_v42 = vmul.f32 %v236_v34, %v236_v34  ;;  %v308_v43 = vmul.f32 %v238_v35, %v238_v35  ;;  %vm417_vm5 = vcmask 24576   ;;  %s420_s3 = scalar_lea.sflag [#allocation6], %s968_s4  ;;  %s692_s15 = scalar_lea.vmem %s1013_s18, 16 }
  0x58   : > { %v983_v3 = vsub.s32 %v268_v2, %v266_v1  ;;  %v241_v10 = vmax.f32 %v239_v8, %v240_v9  ;;  %v272_v26 = vmul.u32 128, %v266_v1  ;;  %p693_p0 = scmp.ne.s32.totalorder %s1013_s18, %s692_s15  ;;  %p1073_p3 = scmp.ne.s32.totalorder %s1067_s22, 0 }
  0x59   : > { %s784_s12 = smov [#allocation9]  }
  0x5a   : > { %v242_v11 = vsub.f32 %v231_v4, %v241_v10  ;;  %v243_v12 = vsub.f32 %v232_v5, %v241_v10  ;;  %v244_v13 = vsub.f32 %v233_v6, %v241_v10  ;;  %v245_v14 = vsub.f32 %v234_v7, %v241_v10  ;;  %p694_p12 = pnand %p693_p0, %p1073_p3  ;;  %s696_s26 = sshll.u32 %s784_s12, 4  ;;  %s697_s26 = int_to_ptr.vmem [resolvable:$false] %s696_s26 }
  0x5b   : > { %v273_v29 = vadd.s32 %v272_v26, %v268_v2  ;;  %s698_s16 = scalar_lea.vmem %s697_s26, 32  ;;  %p699_p7 = scmp.lt.s32.totalorder %s1013_s18, %s697_s26 }
  0x5c   : > { %v246_v15 = vmul.f32 1.442695, %v242_v11  ;;  %v248_v16 = vmul.f32 1.442695, %v243_v12  ;;  %v250_v17 = vmul.f32 1.442695, %v244_v13  ;;  %p695_p13 = pneg %p694_p12  ;;  %p700_p10 = scmp.lt.s32.totalorder %s698_s16, %s692_s15 }
  0x5d   : > { %v252_v18 = vmul.f32 1.442695, %v245_v14  ;;  %vm274_vm0 = vcmp.lt.s32.totalorder %v273_v29, 256 }
  0x5e   : > { %620 = vpow2.f32 %v246_v15  ;;  %p701_p9 = por %p700_p10, %p699_p7 }
  0x5f   : > { %622 = vpow2.f32 %v248_v16 }
  0x60   : > { %624 = vpow2.f32 %v250_v17  ;;  %p702_p11 = pnand %p701_p9, %p695_p13 }
  0x61   : > { %626 = vpow2.f32 %v252_v18 }
  0x68   : > { %v621_v19 = vpop.eup %620 }
  0x69   : > { %v623_v20 = vpop.eup %622 }
  0x6a   : > { %v625_v21 = vpop.eup %624  ;;  %v254_v22 = vadd.f32 %v623_v20, %v621_v19 }
  0x6b   : > { %v627_v23 = vpop.eup %626 }
  0x6c   : > { %v255_v24 = vadd.f32 %v625_v21, %v254_v22 }
  0x6e   : > { %v256_v25 = vadd.f32 %v627_v23, %v255_v24 }
  0x70   : > { %628 = vrcp.f32 %v256_v25 }
  0x7a   : > { %v629_v27 = vpop.eup %628 }
  0x7b   : > { %v258_v28 = vmul.f32 %v629_v27, %v256_v25 }
  0x7d   : > { %v259_v30 = vsub.f32 2.0, %v258_v28 }
  0x7f   : > { %v260_v32 = vmul.f32 %v629_v27, %v259_v30 }
  0x81   : > { %v261_v36 = vmul.f32 %v621_v19, %v260_v32  ;;  %v263_v37 = vmul.f32 %v625_v21, %v260_v32  ;;  %v262_v38 = vmul.f32 %v623_v20, %v260_v32  ;;  %v264_v39 = vmul.f32 %v627_v23, %v260_v32 }
  0x83   : > { %v277_v44 = vsel %vm274_vm0, %v261_v36, 0.0  ;;  %v279_v45 = vsel %vm274_vm0, %v263_v37, 0.0  ;;  %v278_v46 = vsel %vm274_vm0, %v262_v38, 0.0  ;;  %v280_v47 = vsel %vm274_vm0, %v264_v39, 0.0 }
  0x84   : > { %v301_v48 = vmul.f32 %v277_v44, %v277_v44  ;;  %v303_v49 = vmul.f32 %v279_v45, %v279_v45  ;;  %v302_v50 = vmul.f32 %v278_v46, %v278_v46  ;;  %v304_v51 = vmul.f32 %v280_v47, %v280_v47 }
  0x85   : > { %v285_v56 = vmul.f32 %v277_v44, %v235_v31  ;;  %v286_v57 = vmul.f32 %v278_v46, %v236_v34  ;;  %v287_v58 = vmul.f32 %v279_v45, %v237_v33  ;;  %v288_v59 = vmul.f32 %v280_v47, %v238_v35 }
  0x86   : > { %v309_v52 = vadd.f32 %v305_v40, %v301_v48  ;;  %v311_v53 = vadd.f32 %v307_v41, %v303_v49  ;;  %v310_v54 = vadd.f32 %v306_v42, %v302_v50  ;;  %v312_v55 = vadd.f32 %v308_v43, %v304_v51 }
  0x88   : > { %372 = vadd.xlane.f32.xlu0 %v309_v52  ;;  %376 = vadd.xlane.f32.xlu1 %v311_v53 }
  0x8c   : > { %374 = vadd.xlane.f32.xlu0 %v310_v54  ;;  %378 = vadd.xlane.f32.xlu1 %v312_v55 }
  0x90   : > { %328 = vadd.xlane.f32.xlu0 %v285_v56  ;;  %330 = vadd.xlane.f32.xlu1 %v286_v57 }
  0x94   : > { %332 = vadd.xlane.f32.xlu0 %v287_v58  ;;  %334 = vadd.xlane.f32.xlu1 %v288_v59 }
 0x115   : > { %v373_v60 = vpop.xlane.xlu0 %372  ;;  %v377_v61 = vpop.xlane.xlu1 %376 }
 0x116   : > { %v387_v0 = vrot.slane %v373_v60, %v983_v3  ;;  %v395_v4 = vrot.slane %v377_v61, %v983_v3 }
 0x119   : > { %v375_v62 = vpop.xlane.xlu0 %374  ;;  %v379_v63 = vpop.xlane.xlu1 %378 }
 0x11a   : > { %v391_v1 = vrot.slane %v375_v62, %v983_v3  ;;  %v399_v2 = vrot.slane %v379_v63, %v983_v3 }
 0x11c   : > { %v400_v5 = vsel %vm356_vm1, %v391_v1, %v387_v0 }
 0x11d   : > { %v329_v6 = vpop.xlane.xlu0 %328  ;;  %v331_v7 = vpop.xlane.xlu1 %330  ;;  %v401_v8 = vsel %vm358_vm2, %v395_v4, %v400_v5 }
 0x11e   : > { %v343_v9 = vrot.slane %v329_v6, %v983_v3  ;;  %v347_v10 = vrot.slane %v331_v7, %v983_v3  ;;  %v402_v11 = vsel %vm360_vm3, %v399_v2, %v401_v8 }
 0x11f   : > { %v404_v12 = vsel %vm363_vm4, %v402_v11, 0.0 }
 0x120   : > { %405 = vadd.xlane.f32.xlu0 %v404_v12  ;;  %v357_v13 = vsel %vm356_vm1, %v347_v10, %v343_v9 }
 0x121   : > { %v333_v14 = vpop.xlane.xlu0 %332  ;;  %v335_v15 = vpop.xlane.xlu1 %334 }
 0x122   : > { %v351_v16 = vrot.slane %v333_v14, %v983_v3  ;;  %v355_v17 = vrot.slane %v335_v15, %v983_v3 }
 0x124   : > { %v359_v18 = vsel %vm358_vm2, %v351_v16, %v357_v13 }
 0x125   : > { %v361_v19 = vsel %vm360_vm3, %v355_v17, %v359_v18 }
 0x126   : > { %v364_v20 = vsel %vm363_vm4, %v361_v19, 0.0 }
 0x127   : > { %365 = vadd.xlane.f32.xlu1 %v364_v20 }
 0x1ad   : > { %v406_v21 = vpop.xlane.xlu0 %405 }
 0x1ae   : > { %v407_v22 = vadd.f32 1.0, %v406_v21 }
 0x1b0   : > { %630 = vrcp.f32 %v407_v22 }
 0x1b4   : > { %v366_v23 = vpop.xlane.xlu1 %365 }
 0x1b5   : > { %v367_v24 = vadd.f32 1.0, %v366_v23 }
 0x1ba   : > { %v631_v25 = vpop.eup %630 }
 0x1bb   : > { %v409_v26 = vmul.f32 %v631_v25, %v367_v24 }
 0x1bd   : > { %v410_v27 = vsub.f32 1.0, %v409_v26 }
 0x1bf   : > { %v415_v28 = vrot.slane %v410_v27, %v983_v3 }
 0x1c1   : > { %418 = vst.msk [vmem:[%s218_s8] sm:$0x1] %vm417_vm5, %v415_v28 }
 0x1c2   : > { %705 = shalt.err (!%p702_p11)
}
 0x1c3   : > { %s706_s20 = scalar_lea.hbm %s1011_s30, 16  ;;  %s710_s6 = scalar_lea.hbm %s1062_s2, 32 }
 0x1c4   : > { %p707_p1 = scmp.ne.s32.totalorder %s1011_s30, %s706_s20  ;;  %p711_p5 = scmp.lt.u32.totalorder %s1011_s30, %s1062_s2 }
 0x1c5   : > { %p712_p4 = scmp.lt.u32.totalorder %s710_s6, %s706_s20  ;;  %p714_p0 = scmp.lt.u32.totalorder %s706_s20, %s1011_s30 }
 0x1c6   : > { %p708_p6 = pnand %p707_p1, %p1073_p3 }
 0x1c7   : > { %p713_p8 = por %p712_p4, %p711_p5 }
 0x1c8   : > { %p709_p2 = pneg %p708_p6 }
 0x1c9   : > { %p715_p12 = por %p714_p0, %p713_p8 }
 0x1cb   : > { %p716_p13 = pnand %p715_p12, %p709_p2 }
 0x1cd   : > { %719 = shalt.err (!%p716_p13)
}
 0x1ce   : > { %555 = dma.vmem_to_hbm [thread:$0]  (%p1073_p3), %s1013_s18, 16, %s1011_s30, %s420_s3  }
 0x1cf PF: > { %s444_s25 = sand.u32 1, %s758_s9   ;;  %p1074_p7 = scmp.ne.s32.totalorder %s1068_s24, 0 }
 0x1d0   : > { %p1075_p10 = scmp.ge.s32.totalorder %s778_s14, 2  ;;  %s445_s7 = scalar_lea.sflag [#allocation6], %s444_s25 }
 0x1d2   : > { %p565_p9 = pnand %p1075_p10, %p1074_p7 }
 0x1d4   : > { %753 = dma.done.wait (!%p565_p9), %s445_s7, 16  }
 0x1d5   : > { %755 = vsyncadd (!%p565_p9), %s445_s7, 4294967280  ;;  %s21_s14 = sadd.s32 1, %s778_s14   ;;  %s1076_s9 = smov %s762_s10 }
 0x1d6   : > { %p18_p11 = scmp.ge.s32.totalorder %s21_s14, 4   ;;  %s1077_s10 = smov %s766_s11 }
 0x1d7   : > { %s1078_s11 = smov %s856_s23  ;;  %s1079_s12 = smov %s774_s13 }
 0x1d8   : > { %s1080_s13 = smov %s1082_s17  ;;  %20 = sbr.rel (!%p18_p11) target bundleno = 8 (0x8), region = 94 }
 0x1df   :  { %449 = vsyncpa [#allocation5], 1 }
 0x1e0   :  { %451 = vsyncpa [#allocation5 + $0x1], 1 }
 0x1e1   :  { %452 = vsyncpa [#allocation8], 1 }
 0x1e2   :  { %454 = vsyncpa [#allocation8 + $0x1], 1 }
 0x1e3   :  { %455 = vsyncpa [#allocation6], 1 }
 0x1e4   :  { %457 = vsyncpa [#allocation6 + $0x1], 1 }

</bundles_post_ra>
